<compile_context>
chip_gen: v7x
topology: tpu7x:2x2x1
jax: 0.10.0
libtpu: 0.0.40
codegen_flags: <defaults>
</compile_context>

<pallas_src>
import numpy as np
import jax
import jax.numpy as jnp
from jax.experimental import pallas as pl
from jax.experimental.pallas import tpu as pltpu

# --------------------------- model configuration ---------------------------
BATCH = 2
INPUT_NC = 4
REF_INPUT_NC = 4
SPATIAL = 32           # input spatial size (scaled down from 256)
BASE = 16              # scaled down from 64
STYLE_DIM = 8 * BASE   # 128 (scaled down from 512)
N_STYLES = 8
COARSE_IND = 3
MIDDLE_IND = 7
LEAKY_SLOPE = 0.01     # nn.LeakyReLU() default negative_slope

_PARALLEL1 = pltpu.CompilerParams(dimension_semantics=("parallel",))


# ------------------------------ Pallas kernels ------------------------------
def _mm_bias_act_kernel(x_ref, w_ref, sa_ref, o_ref):
    # o = act(x @ w + shift), act(y) = where(y >= 0, y, alpha * y)
    # sa_ref packs [shift; alpha] as a single (2, cout) operand.
    y = jnp.dot(x_ref[...], w_ref[...], preferred_element_type=jnp.float32)
    y = y + sa_ref[0:1, :]
    o_ref[...] = jnp.where(y >= 0.0, y, y * sa_ref[1:2, :])


def _mm_bias_kernel(x_ref, w_ref, b_ref, o_ref):
    o_ref[...] = (jnp.dot(x_ref[...], w_ref[...],
                          preferred_element_type=jnp.float32) + b_ref[...])


def _mm_bias_res_kernel(x_ref, w_ref, b_ref, r_ref, o_ref):
    # bottleneck conv2: matmul + folded BN shift + residual add, one pass.
    o_ref[...] = (jnp.dot(x_ref[...], w_ref[...],
                          preferred_element_type=jnp.float32)
                  + b_ref[...] + r_ref[...])


def _spade_kernel(x_ref, p_ref, wg_ref, bg_ref, wb_ref, bb_ref, o_ref):
    # Per-sample (grid over N): gamma/beta are produced from shared-conv
    # patches by two fused matmuls, then param-free instance norm + modulation.
    x = x_ref[0]                                   # (HW, C) f32
    pp = p_ref[0]                                  # (HW, 9*nh) bf16
    gamma = jnp.dot(pp, wg_ref[...], preferred_element_type=jnp.float32) + bg_ref[...]
    beta = jnp.dot(pp, wb_ref[...], preferred_element_type=jnp.float32) + bb_ref[...]
    mu = jnp.mean(x, axis=0, keepdims=True)
    var = jnp.mean((x - mu) ** 2, axis=0, keepdims=True)
    xn = (x - mu) * jax.lax.rsqrt(var + 1e-5)
    o_ref[0] = xn * (1.0 + gamma) + beta


def _upsample_lat_kernel(mat_ref, xt_ref, xl_ref, wl_ref, bl_ref, o_ref):
    # out = bilinear_upsample(x_top) + conv1x1(x_lat) + b   (FPN merge, fused)
    up = jnp.dot(mat_ref[...], xt_ref[0], preferred_element_type=jnp.float32)
    lat = (jnp.dot(xl_ref[0], wl_ref[...], preferred_element_type=jnp.float32)
           + bl_ref[...])
    o_ref[0] = up + lat


# ------------------------------ kernel wrappers ------------------------------
def _choose_tm(m):
    # tile M for the larger matmuls so the grid can be sharded across
    # TensorCores (v7x); tiny matmuls stay whole.
    return 256 if (m % 256 == 0 and m > 256) else m


def _matmul_call(kernel, x, w, extra_args, extra_specs):
    m, k = x.shape
    cout = w.shape[1]
    tm = _choose_tm(m)
    return pl.pallas_call(
        kernel,
        out_shape=jax.ShapeDtypeStruct((m, cout), jnp.float32),
        grid=(m // tm,),
        in_specs=[pl.BlockSpec((tm, k), lambda i: (i, 0)),
                  pl.BlockSpec((k, cout), lambda i: (0, 0))] + extra_specs,
        out_specs=pl.BlockSpec((tm, cout), lambda i: (i, 0)),
        compiler_params=_PARALLEL1,
    )(x.astype(jnp.bfloat16), w.astype(jnp.bfloat16), *extra_args)


def mm_bias_act(x, w, shift, alpha):
    cout = w.shape[1]
    sa = jnp.stack([shift, alpha], axis=0).astype(jnp.float32)      # (2, cout)
    return _matmul_call(_mm_bias_act_kernel, x, w, [sa],
                        [pl.BlockSpec((2, cout), lambda i: (0, 0))])


def mm_bias(x, w, shift):
    cout = w.shape[1]
    return _matmul_call(_mm_bias_kernel, x, w,
                        [shift.reshape(1, cout).astype(jnp.float32)],
                        [pl.BlockSpec((1, cout), lambda i: (0, 0))])


def mm_bias_res(x, w, shift, res):
    cout = w.shape[1]
    tm = _choose_tm(x.shape[0])
    return _matmul_call(_mm_bias_res_kernel, x, w,
                        [shift.reshape(1, cout).astype(jnp.float32),
                         res.astype(jnp.float32)],
                        [pl.BlockSpec((1, cout), lambda i: (0, 0)),
                         pl.BlockSpec((tm, cout), lambda i: (i, 0))])


# ---------------------------- conv / resize glue ----------------------------
def _im2col(x, k, stride, pad):
    # XLA-side patch extraction (pad + slices + concat); kernels only ever see
    # 2-D (M, K) operands, which keeps Mosaic lowering simple and safe.
    n, h, w, c = x.shape
    xp = jnp.pad(x, ((0, 0), (pad, pad), (pad, pad), (0, 0)))
    ho = (h + 2 * pad - k) // stride + 1
    wo = (w + 2 * pad - k) // stride + 1
    cols = []
    for kh in range(k):
        for kw in range(k):
            cols.append(xp[:, kh:kh + stride * ho:stride,
                           kw:kw + stride * wo:stride, :])
    patches = jnp.concatenate(cols, axis=-1)            # (n, ho, wo, k*k*c)
    return patches.reshape(n * ho * wo, k * k * c), n, ho, wo


def conv2d(x, w_oihw, shift, alpha, *, stride=1, pad=1, scale=None):
    """kxk conv (PyTorch OIHW weights) as im2col + fused Pallas matmul.
    `scale` (e.g. a folded BatchNorm scale) is folded into the weights here."""
    cout, cin, k, _ = w_oihw.shape
    w2d = jnp.transpose(w_oihw, (2, 3, 1, 0)).reshape(k * k * cin, cout)
    if scale is not None:
        w2d = w2d * scale[None, :]
    patches, n, ho, wo = _im2col(x, k, stride, pad)
    out = mm_bias_act(patches, w2d, shift, alpha)
    return out.reshape(n, ho, wo, cout)


def conv2d_w2d(x, w2d, shift, alpha, *, k=3, stride=2, pad=1):
    cout = w2d.shape[1]
    patches, n, ho, wo = _im2col(x, k, stride, pad)
    out = mm_bias_act(patches, w2d, shift, alpha)
    return out.reshape(n, ho, wo, cout)


def _bilinear_matrix(n_out, n_in):
    # bilinear, align_corners=True
    R = np.zeros((n_out, n_in), np.float32)
    for o in range(n_out):
        pos = 0.0 if n_out == 1 else o * (n_in - 1) / (n_out - 1)
        i0 = int(np.floor(pos))
        i1 = min(i0 + 1, n_in - 1)
        w = pos - i0
        R[o, i0] += 1.0 - w
        R[o, i1] += w
    return R


def upsample_add_lateral(x_top, x_lat, w_lat_oihw, b_lat):
    """F.interpolate(x_top, size=x_lat.spatial, bilinear, align_corners=True)
       + Conv2d_1x1(x_lat), fused into one batched Pallas kernel."""
    n, hi, wi, c = x_top.shape
    _, ho, wo, clat = x_lat.shape
    # TODO(synk): at full model scale replace the dense Kronecker interpolation
    # matrix with separable row/col interpolation (R_h @ X @ R_w^T) to bound VMEM.
    mat = jnp.asarray(np.kron(_bilinear_matrix(ho, hi), _bilinear_matrix(wo, wi)),
                      jnp.float32)
    wl = w_lat_oihw[:, :, 0, 0].T.astype(jnp.bfloat16)          # (clat, c)
    xt = x_top.reshape(n, hi * wi, c)
    xl = x_lat.reshape(n, ho * wo, clat).astype(jnp.bfloat16)
    out = pl.pallas_call(
        _upsample_lat_kernel,
        out_shape=jax.ShapeDtypeStruct((n, ho * wo, c), jnp.float32),
        grid=(n,),
        in_specs=[pl.BlockSpec((ho * wo, hi * wi), lambda i: (0, 0)),
                  pl.BlockSpec((1, hi * wi, c), lambda i: (i, 0, 0)),
                  pl.BlockSpec((1, ho * wo, clat), lambda i: (i, 0, 0)),
                  pl.BlockSpec((clat, c), lambda i: (0, 0)),
                  pl.BlockSpec((1, c), lambda i: (0, 0))],
        out_specs=pl.BlockSpec((1, ho * wo, c), lambda i: (i, 0, 0)),
        compiler_params=_PARALLEL1,
    )(mat, xt, xl, wl, b_lat.reshape(1, c))
    return out.reshape(n, ho, wo, c)


# ------------------------------ parameter init ------------------------------
class ParamGen:
    def __init__(self, seed=0):
        self._key = jax.random.PRNGKey(seed)

    def _next(self):
        self._key, k = jax.random.split(self._key)
        return k

    def normal(self, shape, scale=1.0):
        return (scale * jax.random.normal(self._next(), shape)).astype(jnp.float32)

    def uniform(self, shape, lo, hi):
        return jax.random.uniform(self._next(), shape, jnp.float32, lo, hi)


def init_conv(pg, cin, cout, k, bias):
    w = pg.normal((cout, cin, k, k), scale=1.0 / np.sqrt(cin * k * k))
    b = pg.normal((cout,), scale=0.05) if bias else None
    return w, b


def init_bn(pg, c):
    # TODO(synk): BatchNorm2d is evaluated with (synthetic) running statistics,
    # i.e. eval-mode semantics; train-mode batch statistics are not modelled.
    return dict(gamma=1.0 + pg.normal((c,), 0.1), beta=pg.normal((c,), 0.1),
                mean=pg.normal((c,), 0.1), var=pg.uniform((c,), 0.5, 1.5))


def bn_fold(bn, eps=1e-5):
    scale = bn['gamma'] / jnp.sqrt(bn['var'] + eps)
    return scale, bn['beta'] - bn['mean'] * scale


def init_prelu(pg, c):
    return 0.25 + pg.normal((c,), 0.02)


def init_input_layer(pg, in_nc):
    w, _ = init_conv(pg, in_nc, BASE, 3, False)
    return dict(w=w, bn=init_bn(pg, BASE), prelu=init_prelu(pg, BASE))


def init_bottleneck(pg, in_c, depth):
    # TODO(synk): bottleneck_IR source not provided; standard pSp/ArcFace
    # bottleneck_IR (BN -> conv3x3 -> PReLU -> conv3x3(stride) -> BN + shortcut).
    p = dict(bn1=init_bn(pg, in_c),
             w1=init_conv(pg, in_c, depth, 3, False)[0],
             prelu=init_prelu(pg, depth),
             w2=init_conv(pg, depth, depth, 3, False)[0],
             bn2=init_bn(pg, depth))
    if in_c != depth:
        p['sc_w'] = init_conv(pg, in_c, depth, 1, False)[0]
        p['sc_bn'] = init_bn(pg, depth)
    return p


def init_spade(pg, norm_nc, label_nc, nhidden=32):
    # TODO(synk): SPADE_change source not provided; standard SPADE is used
    # (param-free instance norm, conv-generated gamma/beta from the ref map).
    w_sh, b_sh = init_conv(pg, label_nc, nhidden, 3, True)
    w_g, b_g = init_conv(pg, nhidden, norm_nc, 3, True)
    w_b, b_b = init_conv(pg, nhidden, norm_nc, 3, True)
    return dict(w_sh=w_sh, b_sh=b_sh, w_g=w_g, b_g=b_g, w_b=w_b, b_b=b_b)


def init_style_block(pg, in_c, out_c, spatial):
    num_pools = int(np.log2(spatial))
    convs = [init_conv(pg, in_c, out_c, 3, True)]
    convs += [init_conv(pg, out_c, out_c, 3, True) for _ in range(num_pools - 1)]
    # TODO(synk): EqualLinear source not provided; standard StyleGAN2
    # EqualLinear (weight * 1/sqrt(in_dim) * lr_mul, bias * lr_mul, no act).
    lin_w = pg.normal((out_c, out_c), scale=1.0)
    lin_b = jnp.zeros((out_c,), jnp.float32)
    return dict(convs=convs, lin_w=lin_w, lin_b=lin_b, lr_mul=1.0)


def get_blocks_scaled():
    # mirrors get_blocks(50): [(64,64,3),(64,128,4),(128,256,14),(256,512,3)]
    # with all channels scaled by 1/4 -> 24 bottleneck units total, so the
    # hard-coded feature taps at i == 6 / 20 / 23 are preserved.
    cfg = [(BASE, BASE, 3), (BASE, 2 * BASE, 4),
           (2 * BASE, 4 * BASE, 14), (4 * BASE, 8 * BASE, 3)]
    units = []
    for in_c, depth, n in cfg:
        units.append((in_c, depth, 2))
        units.extend((depth, depth, 1) for _ in range(n - 1))
    return units


# ------------------------------ module forwards ------------------------------
def input_layer_forward(p, x):
    # Conv2d(bias=False) + BatchNorm2d + PReLU: BN scale folded into weights,
    # shift + PReLU slope applied in the kernel epilogue.
    s, b = bn_fold(p['bn'])
    return conv2d(x, p['w'], b, p['prelu'], stride=1, pad=1, scale=s)


def bottleneck_forward(p, x, in_c, depth, stride):
    n, h, w, _ = x.shape
    # shortcut path
    if in_c == depth:
        sc = x[:, ::stride, ::stride, :] if stride > 1 else x  # MaxPool2d(1, stride)
        sc_flat = sc.reshape(-1, depth)
    else:
        xs = x[:, ::stride, ::stride, :] if stride > 1 else x
        s_sc, b_sc = bn_fold(p['sc_bn'])
        w_sc = p['sc_w'][:, :, 0, 0].T * s_sc[None, :]          # BN scale folded
        sc_flat = mm_bias(xs.reshape(-1, in_c), w_sc, b_sc)
    # residual path: bn1 affine applied to the UNPADDED input (exact w.r.t. the
    # zero padding of conv1); XLA fuses it with the im2col pad/slices.
    s1, b1 = bn_fold(p['bn1'])
    r_in = x * s1 + b1
    w1 = jnp.transpose(p['w1'], (2, 3, 1, 0)).reshape(9 * in_c, depth)
    patches1, _, _, _ = _im2col(r_in, 3, 1, 1)
    r = mm_bias_act(patches1, w1, jnp.zeros((depth,), jnp.float32), p['prelu'])
    r = r.reshape(n, h, w, depth)
    # conv2 + folded BN2 + residual add, fused into one kernel
    s2, b2 = bn_fold(p['bn2'])
    w2 = jnp.transpose(p['w2'], (2, 3, 1, 0)).reshape(9 * depth, depth) * s2[None, :]
    patches2, _, ho, wo = _im2col(r, 3, stride, 1)
    out = mm_bias_res(patches2, w2, b2, sc_flat)
    return out.reshape(n, ho, wo, depth)


def spade_forward(p, x, ref_feat):
    n, hh, ww, c = x.shape
    nh = p['w_sh'].shape[0]
    hw = hh * ww
    # shared conv + ReLU (alpha = 0)
    h = conv2d(ref_feat, p['w_sh'], p['b_sh'], jnp.zeros((nh,), jnp.float32),
               stride=1, pad=1)
    patches, _, _, _ = _im2col(h, 3, 1, 1)                      # (n*hw, 9*nh)
    patches = patches.reshape(n, hw, 9 * nh).astype(jnp.bfloat16)
    x3 = x.reshape(n, hw, c)
    wg = jnp.transpose(p['w_g'], (2, 3, 1, 0)).reshape(9 * nh, c).astype(jnp.bfloat16)
    wb = jnp.transpose(p['w_b'], (2, 3, 1, 0)).reshape(9 * nh, c).astype(jnp.bfloat16)
    out = pl.pallas_call(
        _spade_kernel,
        out_shape=jax.ShapeDtypeStruct((n, hw, c), jnp.float32),
        grid=(n,),
        in_specs=[pl.BlockSpec((1, hw, c), lambda i: (i, 0, 0)),
                  pl.BlockSpec((1, hw, 9 * nh), lambda i: (i, 0, 0)),
                  pl.BlockSpec((9 * nh, c), lambda i: (0, 0)),
                  pl.BlockSpec((1, c), lambda i: (0, 0)),
                  pl.BlockSpec((9 * nh, c), lambda i: (0, 0)),
                  pl.BlockSpec((1, c), lambda i: (0, 0))],
        out_specs=pl.BlockSpec((1, hw, c), lambda i: (i, 0, 0)),
        compiler_params=_PARALLEL1,
    )(x3, patches, wg, p['b_g'].reshape(1, c), wb, p['b_b'].reshape(1, c))
    return out.reshape(n, hh, ww, c)


# ------------------------- batched style-head branch -------------------------
def _blockdiag_conv_w2d(w_list):
    # Combine per-head 3x3 conv weights into one block-diagonal im2col matrix
    # so one matmul serves all heads of a group (heads are channel-major).
    g = len(w_list)
    co, ci, k, _ = w_list[0].shape
    W = jnp.zeros((k * k, g, ci, g, co), jnp.float32)
    for h, w in enumerate(w_list):
        w2 = jnp.transpose(w, (2, 3, 1, 0)).reshape(k * k, ci, co)
        W = W.at[:, h, :, h, :].set(w2)
    return W.reshape(k * k * g * ci, g * co)


def _blockdiag_linear_w(w_list, lr_muls):
    g = len(w_list)
    o, i_dim = w_list[0].shape
    W = jnp.zeros((g, i_dim, g, o), jnp.float32)
    for h, (w, lm) in enumerate(zip(w_list, lr_muls)):
        W = W.at[h, :, h, :].set((w * (1.0 / np.sqrt(i_dim) * lm)).T)
    return W.reshape(g * i_dim, g * o)


def style_group_forward(style_list, x):
    """Run all GradualStyleBlocks of one group (they share the same input and
    conv-stage count) as batched / block-diagonal matmuls."""
    g = len(style_list)
    out_c = STYLE_DIM
    n_convs = len(style_list[0]['convs'])
    leaky = jnp.full((g * out_c,), LEAKY_SLOPE, jnp.float32)
    # first conv: shared input -> concat head weights along cout (lane-dense)
    w0 = jnp.concatenate(
        [jnp.transpose(p['convs'][0][0], (2, 3, 1, 0)).reshape(-1, out_c)
         for p in style_list], axis=1)
    b0 = jnp.concatenate([p['convs'][0][1] for p in style_list])
    h = conv2d_w2d(x, w0, b0, leaky, k=3, stride=2, pad=1)
    # later convs: block-diagonal weights, one fused call per stage
    for s in range(1, n_convs):
        wbd = _blockdiag_conv_w2d([p['convs'][s][0] for p in style_list])
        bcat = jnp.concatenate([p['convs'][s][1] for p in style_list])
        h = conv2d_w2d(h, wbd, bcat, leaky, k=3, stride=2, pad=1)
    n = h.shape[0]
    hf = h.reshape(n, g * out_c)                  # spatial is 1x1 here
    wlin = _blockdiag_linear_w([p['lin_w'] for p in style_list],
                               [p['lr_mul'] for p in style_list])
    blin = jnp.concatenate([p['lin_b'] * p['lr_mul'] for p in style_list])
    lat = mm_bias(hf, wlin, blin)                 # (n, g*out_c)
    return lat.reshape(n, g, out_c)


# --------------------------------- forward ----------------------------------
def gradual_style_encoder_forward(params, blocks_cfg, x_nchw, ref_nchw):
    x = jnp.transpose(x_nchw, (0, 2, 3, 1)).astype(jnp.float32)     # NCHW -> NHWC
    ref = jnp.transpose(ref_nchw, (0, 2, 3, 1)).astype(jnp.float32)

    x = input_layer_forward(params['input_layer'], x)
    ref = input_layer_forward(params['ref_input_layer'], ref)

    def run_body(h):
        feats = {}
        for i, (p, (in_c, depth, stride)) in enumerate(zip(params['body'], blocks_cfg)):
            h = bottleneck_forward(p, h, in_c, depth, stride)
            if i == 6:
                feats['c1'] = h
            elif i == 20:
                feats['c2'] = h
            elif i == 23:
                feats['c3'] = h
        return feats

    f = run_body(x)
    # NOTE: the reference forward iterates `self.body` (not body_ref) for the
    # ref stream as well, so both streams share the same body weights.
    fr = run_body(ref)

    c3 = spade_forward(params['spade_3'], f['c3'], fr['c3'])
    c2 = spade_forward(params['spade_2'], f['c2'], fr['c2'])
    c1 = spade_forward(params['spade_1'], f['c1'], fr['c1'])

    lat_coarse = style_group_forward(
        [params['styles'][j] for j in range(COARSE_IND)], c3)

    w1, b1 = params['lat1']
    p2 = upsample_add_lateral(c3, c2, w1, b1)
    lat_mid = style_group_forward(
        [params['styles'][j] for j in range(COARSE_IND, MIDDLE_IND)], p2)

    w2, b2 = params['lat2']
    p1 = upsample_add_lateral(p2, c1, w2, b2)
    lat_fine = style_group_forward(
        [params['styles'][j] for j in range(MIDDLE_IND, N_STYLES)], p1)

    return jnp.concatenate([lat_coarse, lat_mid, lat_fine], axis=1)  # (N, 8, D)


# ------------------------------------ main ------------------------------------
if __name__ == "__main__":
    pg = ParamGen(0)
    blocks_cfg = get_blocks_scaled()

    def style_spatial(i):
        return 2 if i < COARSE_IND else (4 if i < MIDDLE_IND else 8)

    params = dict(
        input_layer=init_input_layer(pg, INPUT_NC),
        ref_input_layer=init_input_layer(pg, REF_INPUT_NC),
        body=[init_bottleneck(pg, ic, d) for ic, d, _ in blocks_cfg],
        spade_1=init_spade(pg, 2 * BASE, 2 * BASE),
        spade_2=init_spade(pg, 4 * BASE, 4 * BASE),
        spade_3=init_spade(pg, 8 * BASE, 8 * BASE),
        styles=[init_style_block(pg, STYLE_DIM, STYLE_DIM, style_spatial(i))
                for i in range(N_STYLES)],
        lat1=init_conv(pg, 4 * BASE, STYLE_DIM, 1, True),
        lat2=init_conv(pg, 2 * BASE, STYLE_DIM, 1, True),
    )

    kx, kr = jax.random.split(jax.random.PRNGKey(0))
    x = jax.random.normal(kx, (BATCH, INPUT_NC, SPATIAL, SPATIAL), jnp.float32)
    ref = jax.random.normal(kr, (BATCH, REF_INPUT_NC, SPATIAL, SPATIAL), jnp.float32)

    out = gradual_style_encoder_forward(params, blocks_cfg, x, ref)
    out = jax.block_until_ready(out)
    assert out.shape == (BATCH, N_STYLES, STYLE_DIM), out.shape
    assert bool(jnp.all(jnp.isfinite(out)))
    print("KERNEL_OK")
</pallas_src>

<mosaic_0001>
module attributes {stable_mosaic.version = 11 : i64} {
  func.func @_mm_bias_act_kernel(%arg0: i32, %arg1: memref<256x36xbf16, #tpu.memory_space<vmem>>, %arg2: memref<36x16xbf16, #tpu.memory_space<vmem>>, %arg3: memref<2x16xf32, #tpu.memory_space<vmem>>, %arg4: memref<256x16xf32, #tpu.memory_space<vmem>>) attributes {dimension_semantics = [#tpu.dimension_semantics<parallel>], iteration_bounds = array<i64: 8>, scalar_prefetch = 0 : i64, scratch_operands = 0 : i64, tpu.core_type = #tpu.core_type<tc>, window_params = [{transform_indices = @transform_0, window_bounds = array<i64: 256, 36>}, {pipeline_mode = #tpu.pipeline_mode<synchronous>, transform_indices = @transform_1, window_bounds = array<i64: 36, 16>}, {pipeline_mode = #tpu.pipeline_mode<synchronous>, transform_indices = @transform_2, window_bounds = array<i64: 2, 16>}, {transform_indices = @transform_3, window_bounds = array<i64: 256, 16>}]} {
    %c0 = arith.constant 0 : index
    %c0_0 = arith.constant 0 : index
    %0 = vector.load %arg1[%c0, %c0_0] : memref<256x36xbf16, #tpu.memory_space<vmem>>, vector<256x36xbf16>
    %c0_1 = arith.constant 0 : index
    %c0_2 = arith.constant 0 : index
    %1 = vector.load %arg2[%c0_1, %c0_2] : memref<36x16xbf16, #tpu.memory_space<vmem>>, vector<36x16xbf16>
    %cst = arith.constant dense<0.000000e+00> : vector<256x16xf32>
    %2 = tpu.matmul %0, %1, %cst {dimension_numbers = #tpu.dot_dimension_numbers<[1], [0], [0], [1], [0, 0, 1, 1], [], []>} : vector<256x36xbf16>, vector<36x16xbf16>, vector<256x16xf32> -> vector<256x16xf32>
    %c0_3 = arith.constant 0 : index
    %c0_4 = arith.constant 0 : index
    %3 = vector.load %arg3[%c0_3, %c0_4] : memref<2x16xf32, #tpu.memory_space<vmem>>, vector<1x16xf32>
    %4 = vector.broadcast %3 : vector<1x16xf32> to vector<256x16xf32>
    %5 = arith.addf %2, %4 : vector<256x16xf32>
    %cst_5 = arith.constant 0.000000e+00 : f32
    %6 = vector.broadcast %cst_5 : f32 to vector<256x16xf32>
    %7 = arith.cmpf oge, %5, %6 : vector<256x16xf32>
    %c1 = arith.constant 1 : index
    %c0_6 = arith.constant 0 : index
    %8 = vector.load %arg3[%c1, %c0_6] : memref<2x16xf32, #tpu.memory_space<vmem>>, vector<1x16xf32>
    %9 = vector.broadcast %8 : vector<1x16xf32> to vector<256x16xf32>
    %10 = arith.mulf %5, %9 : vector<256x16xf32>
    %11 = arith.select %7, %5, %10 : vector<256x16xi1>, vector<256x16xf32>
    %c0_7 = arith.constant 0 : index
    %c0_8 = arith.constant 0 : index
    %12 = vector.load %arg4[%c0_7, %c0_8] : memref<256x16xf32, #tpu.memory_space<vmem>>, vector<256x16xf32>
    tpu.vector_store %arg4[%c0_7, %c0_8], %11 {strides = array<i32>} : memref<256x16xf32, #tpu.memory_space<vmem>>, vector<256x16xf32>,
    return
  }
  func.func @transform_0(%arg0: i32) -> (i32, i32) {
    %c0_i32 = arith.constant 0 : i32
    %c0_i32_0 = arith.constant 0 : i32
    return %arg0, %c0_i32 : i32, i32
  }
  func.func @transform_1(%arg0: i32) -> (i32, i32) {
    %c0_i32 = arith.constant 0 : i32
    %c0_i32_0 = arith.constant 0 : i32
    %c0_i32_1 = arith.constant 0 : i32
    return %c0_i32, %c0_i32_0 : i32, i32
  }
  func.func @transform_2(%arg0: i32) -> (i32, i32) {
    %c0_i32 = arith.constant 0 : i32
    %c0_i32_0 = arith.constant 0 : i32
    %c0_i32_1 = arith.constant 0 : i32
    return %c0_i32, %c0_i32_0 : i32, i32
  }
  func.func @transform_3(%arg0: i32) -> (i32, i32) {
    %c0_i32 = arith.constant 0 : i32
    %c0_i32_0 = arith.constant 0 : i32
    return %arg0, %c0_i32 : i32, i32
  }
}

</mosaic_0001>

<bundles_post_ra>
// kernel: tpu_custom_call.1
= control target key start
LH: loop header
LB: loop body
LE: loop exit
PB: predicated region body
PF: predicated region fallthrough
CT: control target
= control target key end

     0   :  { %s884_s12 = smov 0   ;;  %s1088_s0 = inlined_call_operand.vmem [shape: bf16[2048,36], index: 0, kind: input, shape index: {}]   ;;  %s1089_s1 = inlined_call_operand.vmem [shape: bf16[36,16], index: 1, kind: input, shape index: {}]   ;;  %s1090_s2 = inlined_call_operand.vmem [shape: f32[2,16], index: 2, kind: input, shape index: {}]   ;;  %s1091_s3 = inlined_call_operand.vmem [shape: f32[2048,16], index: 3, kind: output, shape index: {}]  }
   0x1 LB: > { %s716_s13 = sadd.s32 4294967295, %s862_s12   ;;  %p720_p0 = scmp.ge.s32.totalorder %s862_s12, 1  ;;  %s862_s12 = sphi %s884_s12, %s13_s12  }
   0x2   : > { %p138_p1 = scmp.lt.s32.totalorder %s862_s12, 9 }
   0x4   : > { %p139_p2 = pnand %p720_p0, %p138_p1 }
   0x5   : > { %v837_v0 = vld [vmem:[%s1089_s1] sm:$0xff] (!%p139_p2)   ;;  %v838_v1 = vld [vmem:[%s1089_s1 + $0x8] sm:$0xff] (!%p139_p2)   ;;  %s721_s18 = sshll.u32 (!%p139_p2), %s716_s13, 5  ;;  %v839_v2 = vld [vmem:[%s1089_s1 + $0x10] ss:$0 sps:$4 sm:$0x33] (!%p139_p2)  }
   0x6   : > { %142 = sbr.rel (%p139_p2) target bundleno = 266 (0x10a), region = 32  ;;  %783 = vmatprep.subr.bf16.mxu0 (!%p139_p2), %v837_v0  ;;  %821 = vmatprep.subr.bf16.mxu1 (!%p139_p2), %v837_v0  ;;  %p163_p3 = scmp.lt.s32.totalorder (!%p139_p2), %s721_s18, 255  ;;  %vm361_vm0 = vcmask (!%p139_p2), 1041408   ;;  %vm312_vm1 = vcmask (!%p139_p2), 293888   ;;  %v944_v20 = vld [vmem:[%s1090_s2] ss:$0 sm:$0xff] (!%p139_p2) }
   0x7   : > { %784 = vmatpush3.bf16.msra.mxu0 (!%p139_p2), %v837_v0  ;;  %824 = vmatpush3.bf16.msra.mxu1 (!%p139_p2), %v837_v0  ;;  %v363_v3 = vsel (!%p139_p2), %vm361_vm0, %v839_v2, 0  ;;  %v950_v22 = vld [vmem:[%s1090_s2 + $0x1] ss:$0 sm:$0xff] (!%p139_p2)  ;;  %vm627_vm2 = vcmask (!%p139_p2), 130048  }
   0x8   : > { %785 = vmatprep.subr.bf16.mxu0 (!%p139_p2), %v838_v1  ;;  %822 = vmatprep.subr.bf16.mxu1 (!%p139_p2), %v838_v1 }
   0xb   : > { %786 = vmatpush3.bf16.msra.mxu0 (!%p139_p2), %v838_v1  ;;  %825 = vmatpush3.bf16.msra.mxu1 (!%p139_p2), %v838_v1 }
   0xc   : > { %827 = vmatprep.subr.msk.bf16.mxu0 (!%p139_p2), %vm361_vm0, %v839_v2  ;;  %828 = vmatprep.subr.msk.bf16.mxu1 (!%p139_p2), %vm361_vm0, %v839_v2 }
   0xd   : > { %s1093_s18 = smov (!%p163_p3, %s721_s18), 255 }
   0xe   : > { %s722_s21 = sshll.u32 %s1093_s18, 2  ;;  %s724_s27 = sshll.u32 %s1093_s18, 3 }
   0xf   : > { %s907_s24 = scalar_lea.vmem %s1088_s0, %s722_s21  ;;  %788 = vmatpush3.bf16.msra.mxu0 %v363_v3  ;;  %826 = vmatpush3.bf16.msra.mxu1 %v363_v3  ;;  %s959_s5 = scalar_lea.vmem %s1091_s3, %s724_s27 }
  0x10   : > { %v840_v4 = vld [vmem:[%s907_s24] sm:$0xff]   ;;  %v842_v6 = vld [vmem:[%s907_s24 + $0x8] sm:$0xff]   ;;  %v844_v8 = vld [vmem:[%s907_s24 + $0x10] sm:$0xff]  }
  0x11   : > { %v841_v5 = vld [vmem:[%s907_s24 + $0x40] sm:$0xff]   ;;  %789 = vmatprep.mubr.msk.bf16.mxu0 %vm312_vm1, %v840_v4  ;;  %v843_v7 = vld [vmem:[%s907_s24 + $0x48] sm:$0xff]   ;;  %v845_v9 = vld [vmem:[%s907_s24 + $0x50] sm:$0xff]  }
  0x12   : > { %805 = vmatprep.mubr.msk.bf16.mxu1 %vm312_vm1, %v841_v5  ;;  %790 = vmatmul.mubr.msk.bf16.vlgmr.msra.gmra.mrb[0].mxu0 %vm312_vm1, %v842_v6  ;;  %v846_v10 = vld [vmem:[%s907_s24 + $0x18] sm:$0xff]   ;;  %v848_v12 = vld [vmem:[%s907_s24 + $0x20] sm:$0xff]   ;;  %v850_v14 = vld [vmem:[%s907_s24 + $0x28] sm:$0xff]  }
  0x13   : > { %806 = vmatmul.mubr.msk.bf16.vlgmr.msra.gmra.mrb[0].mxu1 %vm312_vm1, %v843_v7  ;;  %793 = vmatprep.mubr.msk.bf16.mxu0 %vm312_vm1, %v844_v8  ;;  %v847_v11 = vld [vmem:[%s907_s24 + $0x58] sm:$0xff]   ;;  %v849_v13 = vld [vmem:[%s907_s24 + $0x60] sm:$0xff]   ;;  %v851_v15 = vld [vmem:[%s907_s24 + $0x68] sm:$0xff]  }
  0x14   : > { %809 = vmatprep.mubr.msk.bf16.mxu1 %vm312_vm1, %v845_v9  ;;  %v852_v16 = vld [vmem:[%s907_s24 + $0x30] sm:$0xff]   ;;  %v854_v18 = vld [vmem:[%s907_s24 + $0x38] sm:$0xff]  }
  0x15   : > { %v853_v17 = vld [vmem:[%s907_s24 + $0x70] sm:$0xff]   ;;  %v855_v19 = vld [vmem:[%s907_s24 + $0x78] sm:$0xff]  }
  0x1a   : > { %794 = vmatmul.mubr.msk.bf16.gmra.mrb[4].mxu0 %vm312_vm1, %v846_v10 }
  0x1b   : > { %810 = vmatmul.mubr.msk.bf16.gmra.mrb[4].mxu1 %vm312_vm1, %v847_v11  ;;  %797 = vmatprep.mubr.msk.bf16.mxu0 %vm312_vm1, %v848_v12 }
  0x1c   : > { %813 = vmatprep.mubr.msk.bf16.mxu1 %vm312_vm1, %v849_v13 }
  0x22   : > { %798 = vmatmul.mubr.msk.bf16.gmra.mrb[8].mxu0 %vm312_vm1, %v850_v14 }
  0x23   : > { %814 = vmatmul.mubr.msk.bf16.gmra.mrb[8].mxu1 %vm312_vm1, %v851_v15  ;;  %801 = vmatprep.mubr.msk.bf16.mxu0 %vm312_vm1, %v852_v16 }
  0x24   : > { %817 = vmatprep.mubr.msk.bf16.mxu1 %vm312_vm1, %v853_v17 }
  0x2a   : > { %802 = vmatmul.mubr.msk.bf16.gmra.mrb[12].mxu0 %vm312_vm1, %v854_v18 }
  0x2b   : > { %818 = vmatmul.mubr.msk.bf16.gmra.mrb[12].mxu1 %vm312_vm1, %v855_v19 }
  0xe5   : > { %v791_v21 = vpop.f32.mrb[0].mxu0 }
  0xe6   : > { %v807_v23 = vpop.f32.mrb[0].mxu1  ;;  %v408_v24 = vadd.f32 %v791_v21, %v944_v20  ;;  %v399_v26 = vpop.f32.mrb[1].mxu0 }
  0xe7   : > { %v472_v25 = vadd.f32 %v807_v23, %v944_v20  ;;  %v463_v27 = vpop.f32.mrb[1].mxu1  ;;  %v400_v28 = vadd.f32 %v944_v20, %v399_v26  ;;  %v792_v30 = vpop.f32.mrb[2].mxu0 }
  0xe8   : > { %v464_v29 = vadd.f32 %v944_v20, %v463_v27  ;;  %v808_v31 = vpop.f32.mrb[2].mxu1  ;;  %vm528_vm3 = vcmp.ge.f32.partialorder %v408_v24, 0.0  ;;  %v565_v32 = vmul.f32 %v950_v22, %v408_v24  ;;  %v402_v34 = vpop.f32.mrb[3].mxu0  ;;  %v411_v40 = vadd.f32 %v792_v30, %v944_v20 }
  0xe9   : > { %vm544_vm4 = vcmp.ge.f32.partialorder %v472_v25, 0.0  ;;  %v581_v33 = vmul.f32 %v950_v22, %v472_v25  ;;  %v466_v35 = vpop.f32.mrb[3].mxu1  ;;  %vm526_vm5 = vcmp.ge.f32.partialorder %v400_v28, 0.0  ;;  %v563_v36 = vmul.f32 %v950_v22, %v400_v28 }
  0xea   : > { %vm542_vm6 = vcmp.ge.f32.partialorder %v464_v29, 0.0  ;;  %v579_v37 = vmul.f32 %v950_v22, %v464_v29  ;;  %v597_v38 = vsel %vm528_vm3, %v408_v24, %v565_v32  ;;  %v475_v41 = vadd.f32 %v808_v31, %v944_v20 }
  0xeb   : > { %v613_v39 = vsel %vm544_vm4, %v472_v25, %v581_v33  ;;  %630 = vst.msk [vmem:[%s959_s5 + $0x10] sm:$0xff] %vm627_vm2, %v597_v38  ;;  %v595_v42 = vsel %vm526_vm5, %v400_v28, %v563_v36  ;;  %v403_v44 = vadd.f32 %v944_v20, %v402_v34  ;;  %v467_v45 = vadd.f32 %v944_v20, %v466_v35 }
  0xec   : > { %646 = vst.msk [vmem:[%s959_s5 + $0x90] sm:$0xff] %vm627_vm2, %v613_v39  ;;  %v611_v43 = vsel %vm542_vm6, %v464_v29, %v579_v37  ;;  %628 = vst.msk [vmem:[%s959_s5] sm:$0xff] %vm627_vm2, %v595_v42  ;;  %vm529_vm7 = vcmp.ge.f32.partialorder %v411_v40, 0.0  ;;  %v566_v46 = vmul.f32 %v950_v22, %v411_v40  ;;  %vm545_vm8 = vcmp.ge.f32.partialorder %v475_v41, 0.0 }
  0xed   : > { %644 = vst.msk [vmem:[%s959_s5 + $0x80] sm:$0xff] %vm627_vm2, %v611_v43  ;;  %v582_v47 = vmul.f32 %v950_v22, %v475_v41  ;;  %vm527_vm9 = vcmp.ge.f32.partialorder %v403_v44, 0.0  ;;  %v564_v48 = vmul.f32 %v950_v22, %v403_v44  ;;  %vm543_vm10 = vcmp.ge.f32.partialorder %v467_v45, 0.0  ;;  %v795_v50 = vpop.f32.mrb[4].mxu0 }
  0xee   : > { %v580_v49 = vmul.f32 %v950_v22, %v467_v45  ;;  %v811_v51 = vpop.f32.mrb[4].mxu1  ;;  %v598_v52 = vsel %vm529_vm7, %v411_v40, %v566_v46  ;;  %v424_v54 = vadd.f32 %v795_v50, %v944_v20  ;;  %v415_v56 = vpop.f32.mrb[5].mxu0 }
  0xef   : > { %v614_v53 = vsel %vm545_vm8, %v475_v41, %v582_v47  ;;  %v488_v55 = vadd.f32 %v811_v51, %v944_v20  ;;  %v479_v57 = vpop.f32.mrb[5].mxu1  ;;  %631 = vst.msk [vmem:[%s959_s5 + $0x18] sm:$0xff] %vm627_vm2, %v598_v52  ;;  %v596_v58 = vsel %vm527_vm9, %v403_v44, %v564_v48  ;;  %v416_v60 = vadd.f32 %v944_v20, %v415_v56  ;;  %v796_v62 = vpop.f32.mrb[6].mxu0 }
  0xf0   : > { %647 = vst.msk [vmem:[%s959_s5 + $0x98] sm:$0xff] %vm627_vm2, %v614_v53  ;;  %v612_v59 = vsel %vm543_vm10, %v467_v45, %v580_v49  ;;  %v480_v61 = vadd.f32 %v944_v20, %v479_v57  ;;  %v812_v63 = vpop.f32.mrb[6].mxu1  ;;  %629 = vst.msk [vmem:[%s959_s5 + $0x8] sm:$0xff] %vm627_vm2, %v596_v58  ;;  %vm532_vm11 = vcmp.ge.f32.partialorder %v424_v54, 0.0  ;;  %v569_v0 = vmul.f32 %v950_v22, %v424_v54  ;;  %v418_v2 = vpop.f32.mrb[7].mxu0 }
  0xf1   : > { %645 = vst.msk [vmem:[%s959_s5 + $0x88] sm:$0xff] %vm627_vm2, %v612_v59  ;;  %vm548_vm12 = vcmp.ge.f32.partialorder %v488_v55, 0.0  ;;  %v585_v1 = vmul.f32 %v950_v22, %v488_v55  ;;  %v482_v3 = vpop.f32.mrb[7].mxu1  ;;  %vm530_vm13 = vcmp.ge.f32.partialorder %v416_v60, 0.0  ;;  %v567_v4 = vmul.f32 %v950_v22, %v416_v60 }
  0xf2   : > { %vm546_vm14 = vcmp.ge.f32.partialorder %v480_v61, 0.0  ;;  %v583_v5 = vmul.f32 %v950_v22, %v480_v61  ;;  %v601_v6 = vsel %vm532_vm11, %v424_v54, %v569_v0  ;;  %v427_v8 = vadd.f32 %v796_v62, %v944_v20 }
  0xf3   : > { %v617_v7 = vsel %vm548_vm12, %v488_v55, %v585_v1  ;;  %v491_v9 = vadd.f32 %v812_v63, %v944_v20  ;;  %634 = vst.msk [vmem:[%s959_s5 + $0x30] sm:$0xff] %vm627_vm2, %v601_v6  ;;  %v599_v10 = vsel %vm530_vm13, %v416_v60, %v567_v4  ;;  %v419_v12 = vadd.f32 %v944_v20, %v418_v2 }
  0xf4   : > { %650 = vst.msk [vmem:[%s959_s5 + $0xb0] sm:$0xff] %vm627_vm2, %v617_v7  ;;  %v615_v11 = vsel %vm546_vm14, %v480_v61, %v583_v5  ;;  %v483_v13 = vadd.f32 %v944_v20, %v482_v3  ;;  %632 = vst.msk [vmem:[%s959_s5 + $0x20] sm:$0xff] %vm627_vm2, %v599_v10  ;;  %vm533_vm15 = vcmp.ge.f32.partialorder %v427_v8, 0.0  ;;  %v570_v14 = vmul.f32 %v950_v22, %v427_v8 }
  0xf5   : > { %648 = vst.msk [vmem:[%s959_s5 + $0xa0] sm:$0xff] %vm627_vm2, %v615_v11  ;;  %vm549_vm0 = vcmp.ge.f32.partialorder %v491_v9, 0.0  ;;  %v586_v15 = vmul.f32 %v950_v22, %v491_v9  ;;  %vm531_vm1 = vcmp.ge.f32.partialorder %v419_v12, 0.0  ;;  %v568_v16 = vmul.f32 %v950_v22, %v419_v12  ;;  %v799_v18 = vpop.f32.mrb[8].mxu0 }
  0xf6   : > { %vm547_vm3 = vcmp.ge.f32.partialorder %v483_v13, 0.0  ;;  %v584_v17 = vmul.f32 %v950_v22, %v483_v13  ;;  %v815_v19 = vpop.f32.mrb[8].mxu1  ;;  %v602_v21 = vsel %vm533_vm15, %v427_v8, %v570_v14  ;;  %v440_v24 = vadd.f32 %v799_v18, %v944_v20  ;;  %v431_v26 = vpop.f32.mrb[9].mxu0 }
  0xf7   : > { %v618_v23 = vsel %vm549_vm0, %v491_v9, %v586_v15  ;;  %v504_v25 = vadd.f32 %v815_v19, %v944_v20  ;;  %v495_v27 = vpop.f32.mrb[9].mxu1  ;;  %635 = vst.msk [vmem:[%s959_s5 + $0x38] sm:$0xff] %vm627_vm2, %v602_v21  ;;  %v600_v28 = vsel %vm531_vm1, %v419_v12, %v568_v16  ;;  %v432_v30 = vadd.f32 %v944_v20, %v431_v26  ;;  %v800_v32 = vpop.f32.mrb[10].mxu0 }
  0xf8   : > { %651 = vst.msk [vmem:[%s959_s5 + $0xb8] sm:$0xff] %vm627_vm2, %v618_v23  ;;  %v616_v29 = vsel %vm547_vm3, %v483_v13, %v584_v17  ;;  %v496_v31 = vadd.f32 %v944_v20, %v495_v27  ;;  %v816_v33 = vpop.f32.mrb[10].mxu1  ;;  %633 = vst.msk [vmem:[%s959_s5 + $0x28] sm:$0xff] %vm627_vm2, %v600_v28  ;;  %vm536_vm4 = vcmp.ge.f32.partialorder %v440_v24, 0.0  ;;  %v573_v34 = vmul.f32 %v950_v22, %v440_v24  ;;  %v434_v36 = vpop.f32.mrb[11].mxu0 }
  0xf9   : > { %649 = vst.msk [vmem:[%s959_s5 + $0xa8] sm:$0xff] %vm627_vm2, %v616_v29  ;;  %vm552_vm5 = vcmp.ge.f32.partialorder %v504_v25, 0.0  ;;  %v589_v35 = vmul.f32 %v950_v22, %v504_v25  ;;  %v498_v37 = vpop.f32.mrb[11].mxu1  ;;  %vm534_vm6 = vcmp.ge.f32.partialorder %v432_v30, 0.0  ;;  %v571_v38 = vmul.f32 %v950_v22, %v432_v30 }
  0xfa   : > { %vm550_vm7 = vcmp.ge.f32.partialorder %v496_v31, 0.0  ;;  %v587_v39 = vmul.f32 %v950_v22, %v496_v31  ;;  %v605_v40 = vsel %vm536_vm4, %v440_v24, %v573_v34  ;;  %v443_v42 = vadd.f32 %v800_v32, %v944_v20 }
  0xfb   : > { %v621_v41 = vsel %vm552_vm5, %v504_v25, %v589_v35  ;;  %v507_v43 = vadd.f32 %v816_v33, %v944_v20  ;;  %638 = vst.msk [vmem:[%s959_s5 + $0x50] sm:$0xff] %vm627_vm2, %v605_v40  ;;  %v603_v44 = vsel %vm534_vm6, %v432_v30, %v571_v38  ;;  %v435_v46 = vadd.f32 %v944_v20, %v434_v36 }
  0xfc   : > { %654 = vst.msk [vmem:[%s959_s5 + $0xd0] sm:$0xff] %vm627_vm2, %v621_v41  ;;  %v619_v45 = vsel %vm550_vm7, %v496_v31, %v587_v39  ;;  %v499_v47 = vadd.f32 %v944_v20, %v498_v37  ;;  %636 = vst.msk [vmem:[%s959_s5 + $0x40] sm:$0xff] %vm627_vm2, %v603_v44  ;;  %vm537_vm8 = vcmp.ge.f32.partialorder %v443_v42, 0.0  ;;  %v574_v48 = vmul.f32 %v950_v22, %v443_v42 }
  0xfd   : > { %652 = vst.msk [vmem:[%s959_s5 + $0xc0] sm:$0xff] %vm627_vm2, %v619_v45  ;;  %vm553_vm9 = vcmp.ge.f32.partialorder %v507_v43, 0.0  ;;  %v590_v49 = vmul.f32 %v950_v22, %v507_v43  ;;  %vm535_vm10 = vcmp.ge.f32.partialorder %v435_v46, 0.0  ;;  %v572_v50 = vmul.f32 %v950_v22, %v435_v46  ;;  %v803_v52 = vpop.f32.mrb[12].mxu0 }
  0xfe   : > { %vm551_vm11 = vcmp.ge.f32.partialorder %v499_v47, 0.0  ;;  %v588_v51 = vmul.f32 %v950_v22, %v499_v47  ;;  %v819_v53 = vpop.f32.mrb[12].mxu1  ;;  %v606_v54 = vsel %vm537_vm8, %v443_v42, %v574_v48  ;;  %v456_v56 = vadd.f32 %v803_v52, %v944_v20  ;;  %v447_v58 = vpop.f32.mrb[13].mxu0 }
  0xff   : > { %v622_v55 = vsel %vm553_vm9, %v507_v43, %v590_v49  ;;  %v520_v57 = vadd.f32 %v819_v53, %v944_v20  ;;  %v511_v59 = vpop.f32.mrb[13].mxu1  ;;  %639 = vst.msk [vmem:[%s959_s5 + $0x58] sm:$0xff] %vm627_vm2, %v606_v54  ;;  %v604_v60 = vsel %vm535_vm10, %v435_v46, %v572_v50  ;;  %v448_v62 = vadd.f32 %v944_v20, %v447_v58  ;;  %v804_v0 = vpop.f32.mrb[14].mxu0 }
 0x100   : > { %655 = vst.msk [vmem:[%s959_s5 + $0xd8] sm:$0xff] %vm627_vm2, %v622_v55  ;;  %v620_v61 = vsel %vm551_vm11, %v499_v47, %v588_v51  ;;  %v512_v63 = vadd.f32 %v944_v20, %v511_v59  ;;  %v820_v1 = vpop.f32.mrb[14].mxu1  ;;  %637 = vst.msk [vmem:[%s959_s5 + $0x48] sm:$0xff] %vm627_vm2, %v604_v60  ;;  %vm540_vm12 = vcmp.ge.f32.partialorder %v456_v56, 0.0  ;;  %v577_v2 = vmul.f32 %v950_v22, %v456_v56  ;;  %v450_v4 = vpop.f32.mrb[15].mxu0 }
 0x101   : > { %653 = vst.msk [vmem:[%s959_s5 + $0xc8] sm:$0xff] %vm627_vm2, %v620_v61  ;;  %vm556_vm13 = vcmp.ge.f32.partialorder %v520_v57, 0.0  ;;  %v593_v3 = vmul.f32 %v950_v22, %v520_v57  ;;  %v514_v5 = vpop.f32.mrb[15].mxu1  ;;  %vm538_vm14 = vcmp.ge.f32.partialorder %v448_v62, 0.0  ;;  %v575_v6 = vmul.f32 %v950_v22, %v448_v62 }
 0x102   : > { %vm554_vm15 = vcmp.ge.f32.partialorder %v512_v63, 0.0  ;;  %v591_v7 = vmul.f32 %v950_v22, %v512_v63  ;;  %v609_v8 = vsel %vm540_vm12, %v456_v56, %v577_v2  ;;  %v459_v10 = vadd.f32 %v804_v0, %v944_v20 }
 0x103   : > { %v625_v9 = vsel %vm556_vm13, %v520_v57, %v593_v3  ;;  %v523_v11 = vadd.f32 %v820_v1, %v944_v20  ;;  %642 = vst.msk [vmem:[%s959_s5 + $0x70] sm:$0xff] %vm627_vm2, %v609_v8  ;;  %v607_v12 = vsel %vm538_vm14, %v448_v62, %v575_v6  ;;  %v451_v14 = vadd.f32 %v944_v20, %v450_v4 }
 0x104   : > { %658 = vst.msk [vmem:[%s959_s5 + $0xf0] sm:$0xff] %vm627_vm2, %v625_v9  ;;  %v623_v13 = vsel %vm554_vm15, %v512_v63, %v591_v7  ;;  %v515_v15 = vadd.f32 %v944_v20, %v514_v5  ;;  %640 = vst.msk [vmem:[%s959_s5 + $0x60] sm:$0xff] %vm627_vm2, %v607_v12  ;;  %vm541_vm0 = vcmp.ge.f32.partialorder %v459_v10, 0.0  ;;  %v578_v16 = vmul.f32 %v950_v22, %v459_v10 }
 0x105   : > { %656 = vst.msk [vmem:[%s959_s5 + $0xe0] sm:$0xff] %vm627_vm2, %v623_v13  ;;  %vm557_vm1 = vcmp.ge.f32.partialorder %v523_v11, 0.0  ;;  %v594_v17 = vmul.f32 %v950_v22, %v523_v11  ;;  %vm539_vm3 = vcmp.ge.f32.partialorder %v451_v14, 0.0  ;;  %v576_v18 = vmul.f32 %v950_v22, %v451_v14 }
 0x106   : > { %vm555_vm4 = vcmp.ge.f32.partialorder %v515_v15, 0.0  ;;  %v592_v19 = vmul.f32 %v950_v22, %v515_v15  ;;  %v610_v21 = vsel %vm541_vm0, %v459_v10, %v578_v16 }
 0x107   : > { %v626_v20 = vsel %vm557_vm1, %v523_v11, %v594_v17  ;;  %643 = vst.msk [vmem:[%s959_s5 + $0x78] sm:$0xff] %vm627_vm2, %v610_v21  ;;  %v608_v23 = vsel %vm539_vm3, %v451_v14, %v576_v18 }
 0x108   : > { %659 = vst.msk [vmem:[%s959_s5 + $0xf8] sm:$0xff] %vm627_vm2, %v626_v20  ;;  %v624_v24 = vsel %vm555_vm4, %v515_v15, %v592_v19  ;;  %641 = vst.msk [vmem:[%s959_s5 + $0x68] sm:$0xff] %vm627_vm2, %v608_v23 }
 0x109   : > { %657 = vst.msk [vmem:[%s959_s5 + $0xe8] sm:$0xff] %vm627_vm2, %v624_v24 }
 0x10a PF: > { %s13_s12 = sadd.s32 1, %s862_s12  }
 0x10b   : > { %p10_p4 = scmp.ge.s32.totalorder %s13_s12, 10  }
 0x10d   :  { %12 = sbr.rel (!%p10_p4) target bundleno = 1 (0x1), region = 62 }

</bundles_post_ra>
